<compile_context>
chip_gen: v7x
topology: tpu7x:2x2x1
jax: 0.10.0
libtpu: 0.0.40
codegen_flags: <defaults>
</compile_context>

<pallas_src>
import functools

import jax
import jax.numpy as jnp
from jax.experimental import pallas as pl
from jax.experimental.pallas import tpu as pltpu

HIDDEN = 100       # logical hidden width (matches nn.Linear(feature_dim, 100))
OUT = 2            # logical output width (matches nn.Linear(100, 2))
HIDDEN_PAD = 128   # lane-aligned hidden width
OUT_PAD = 128      # lane-dense output width


def _round_up(n, m):
    return ((n + m - 1) // m) * m


def _domain_disc_kernel(x_ref, w1_ref, b1_ref, w2_ref, b2_ref, o_ref):
    # Layer 1: bf16 MXU matmul with f32 accumulation; bias + ReLU in f32 (VPU).
    h = jnp.dot(x_ref[...], w1_ref[...], preferred_element_type=jnp.float32)
    h = jnp.maximum(h + b1_ref[...], 0.0)
    # Layer 2: single cast of the activations to bf16 for the MXU, f32 acc.
    out = jnp.dot(h.astype(w2_ref.dtype), w2_ref[...],
                  preferred_element_type=jnp.float32)
    # Lane-dense (TB, 128) store -> unmasked vst + dense DMA writeback.
    o_ref[...] = (out + b2_ref[...]).astype(o_ref.dtype)


def prepare_params(w1, b1, w2, b2, compute_dtype=jnp.bfloat16):
    """Pad hidden 100->128 and output 2->128 with zeros; cast weights to bf16.

    Done once at init.  Zero padding keeps the math exact: padded hidden lanes
    stay at ReLU(0 + 0) = 0 and contribute nothing through the (zeroed) extra
    rows of w2; padded output lanes are sliced off in the wrapper.
    Biases stay f32 (they are added to the f32 accumulator on the VPU).
    """
    feature_dim = w1.shape[0]
    b1 = jnp.asarray(b1, jnp.float32).reshape(1, -1)
    b2 = jnp.asarray(b2, jnp.float32).reshape(1, -1)
    w1p = jnp.zeros((feature_dim, HIDDEN_PAD), jnp.float32).at[:, :HIDDEN].set(w1)
    b1p = jnp.zeros((1, HIDDEN_PAD), jnp.float32).at[:, :HIDDEN].set(b1)
    w2p = jnp.zeros((HIDDEN_PAD, OUT_PAD), jnp.float32).at[:HIDDEN, :OUT].set(w2)
    b2p = jnp.zeros((1, OUT_PAD), jnp.float32).at[:, :OUT].set(b2)
    return (w1p.astype(compute_dtype), b1p, w2p.astype(compute_dtype), b2p)


@functools.partial(jax.jit, static_argnames=("block_b",))
def domain_discriminator(x, params, block_b=512):
    """Pallas forward pass of DomainDiscriminator.

    x:      (B, F) float32
    params: output of prepare_params() (padded, bf16 weights / f32 biases)
    returns (B, 2) float32
    """
    w1p, b1p, w2p, b2p = params
    B, F = x.shape
    compute_dtype = w1p.dtype

    # Batch tile: largest multiple of 16 up to block_b (512 fits comfortably
    # inside the 32 MiB scoped VMEM budget on every generation incl. v7x).
    tb = min(block_b, _round_up(B, 16))
    b_pad = _round_up(B, tb)

    x_p = x.astype(compute_dtype)
    if b_pad != B:
        x_p = jnp.pad(x_p, ((0, b_pad - B), (0, 0)))

    grid = (b_pad // tb,)

    flops = 2 * b_pad * F * HIDDEN_PAD + 2 * b_pad * HIDDEN_PAD * OUT_PAD
    bytes_accessed = (
        x_p.size * x_p.dtype.itemsize
        + sum(p.size * p.dtype.itemsize for p in params)
        + b_pad * OUT_PAD * 4
    )

    out_padded = pl.pallas_call(
        _domain_disc_kernel,
        out_shape=jax.ShapeDtypeStruct((b_pad, OUT_PAD), jnp.float32),
        grid_spec=pltpu.PrefetchScalarGridSpec(
            num_scalar_prefetch=0,
            grid=grid,
            in_specs=[
                # x: streamed per batch tile (double-buffered by Pallas).
                pl.BlockSpec((tb, F), lambda i: (i, 0)),
                # weights / biases: constant index_map -> DMA'd once, resident.
                pl.BlockSpec((F, HIDDEN_PAD), lambda i: (0, 0)),
                pl.BlockSpec((1, HIDDEN_PAD), lambda i: (0, 0)),
                pl.BlockSpec((HIDDEN_PAD, OUT_PAD), lambda i: (0, 0)),
                pl.BlockSpec((1, OUT_PAD), lambda i: (0, 0)),
            ],
            out_specs=pl.BlockSpec((tb, OUT_PAD), lambda i: (i, 0)),
        ),
        compiler_params=pltpu.CompilerParams(
            dimension_semantics=("parallel",),      # shards tiles across TCs on v7x
            vmem_limit_bytes=32 * 1024 * 1024,      # safe on v5e/v6e/v7x
        ),
        cost_estimate=pl.CostEstimate(
            flops=flops, transcendentals=0, bytes_accessed=bytes_accessed),
    )(x_p, w1p, b1p, w2p, b2p)

    # Slice away batch padding and the zero output lanes.
    return out_padded[:B, :OUT]


def init_params(key, feature_dim, hidden=HIDDEN, out_dim=OUT, dtype=jnp.float32):
    """Deterministic synthetic parameter init (shapes match nn.Linear)."""
    k1, k2, k3, k4 = jax.random.split(key, 4)
    s1 = 1.0 / jnp.sqrt(feature_dim)
    s2 = 1.0 / jnp.sqrt(hidden)
    w1 = jax.random.uniform(k1, (feature_dim, hidden), dtype, -s1, s1)
    b1 = jax.random.uniform(k2, (1, hidden), dtype, -s1, s1)
    w2 = jax.random.uniform(k3, (hidden, out_dim), dtype, -s2, s2)
    b2 = jax.random.uniform(k4, (1, out_dim), dtype, -s2, s2)
    return w1, b1, w2, b2


def reference_f32(x, w1, b1, w2, b2):
    """Pure-JAX f32 reference matching the PyTorch forward exactly."""
    h = jnp.maximum(x @ w1 + b1.reshape(1, -1), 0.0)
    return h @ w2 + b2.reshape(1, -1)


def reference_bf16(x, w1, b1, w2, b2):
    """Reference emulating the kernel's bf16-input / f32-accumulate matmuls."""
    bf = lambda a: a.astype(jnp.bfloat16)
    h = jnp.dot(bf(x), bf(w1), preferred_element_type=jnp.float32)
    h = jnp.maximum(h + b1.reshape(1, -1), 0.0)
    out = jnp.dot(bf(h), bf(w2), preferred_element_type=jnp.float32)
    return out + b2.reshape(1, -1)


if __name__ == "__main__":
    key = jax.random.PRNGKey(0)
    kx, kp = jax.random.split(key)

    batch = 8          # intentionally not a multiple of the tile: exercises padding
    feature_dim = 32

    x = jax.random.normal(kx, (batch, feature_dim), jnp.float32)
    w1, b1, w2, b2 = init_params(kp, feature_dim)

    params = prepare_params(w1, b1, w2, b2)          # pad + cast once at init
    out = domain_discriminator(x, params)
    out = jax.block_until_ready(out)
    assert out.shape == (batch, OUT), out.shape

    # Tight check vs a bf16-emulated reference (same matmul precision).
    ref_bf16 = reference_bf16(x, w1, b1, w2, b2)
    assert jnp.allclose(out, ref_bf16, atol=2e-3, rtol=2e-3), (
        f"bf16-ref max err = {jnp.max(jnp.abs(out - ref_bf16))}"
    )
    # Loose check vs the exact f32 PyTorch-equivalent reference.
    ref_f32 = reference_f32(x, w1, b1, w2, b2)
    assert jnp.allclose(out, ref_f32, atol=6e-2, rtol=6e-2), (
        f"f32-ref max err = {jnp.max(jnp.abs(out - ref_f32))}"
    )

    print("KERNEL_OK")
</pallas_src>

<mosaic_0001>
module attributes {stable_mosaic.version = 11 : i64} {
  func.func @_domain_disc_kernel(%arg0: i32, %arg1: memref<16x32xbf16, #tpu.memory_space<vmem>>, %arg2: memref<32x128xbf16, #tpu.memory_space<vmem>>, %arg3: memref<1x128xf32, #tpu.memory_space<vmem>>, %arg4: memref<128x128xbf16, #tpu.memory_space<vmem>>, %arg5: memref<1x128xf32, #tpu.memory_space<vmem>>, %arg6: memref<16x128xf32, #tpu.memory_space<vmem>>) attributes {dimension_semantics = [#tpu.dimension_semantics<parallel>], iteration_bounds = array<i64: 1>, scalar_prefetch = 0 : i64, scratch_operands = 0 : i64, tpu.core_type = #tpu.core_type<tc>, window_params = [{transform_indices = @transform_0, window_bounds = array<i64: 16, 32>}, {pipeline_mode = #tpu.pipeline_mode<synchronous>, transform_indices = @transform_1, window_bounds = array<i64: 32, 128>}, {pipeline_mode = #tpu.pipeline_mode<synchronous>, transform_indices = @transform_2, window_bounds = array<i64: 1, 128>}, {pipeline_mode = #tpu.pipeline_mode<synchronous>, transform_indices = @transform_3, window_bounds = array<i64: 128, 128>}, {pipeline_mode = #tpu.pipeline_mode<synchronous>, transform_indices = @transform_4, window_bounds = array<i64: 1, 128>}, {transform_indices = @transform_5, window_bounds = array<i64: 16, 128>}]} {
    %c0 = arith.constant 0 : index
    %c0_0 = arith.constant 0 : index
    %0 = vector.load %arg1[%c0, %c0_0] : memref<16x32xbf16, #tpu.memory_space<vmem>>, vector<16x32xbf16>
    %c0_1 = arith.constant 0 : index
    %c0_2 = arith.constant 0 : index
    %1 = vector.load %arg2[%c0_1, %c0_2] : memref<32x128xbf16, #tpu.memory_space<vmem>>, vector<32x128xbf16>
    %cst = arith.constant dense<0.000000e+00> : vector<16x128xf32>
    %2 = tpu.matmul %0, %1, %cst {dimension_numbers = #tpu.dot_dimension_numbers<[1], [0], [0], [1], [0, 0, 1, 1], [], []>} : vector<16x32xbf16>, vector<32x128xbf16>, vector<16x128xf32> -> vector<16x128xf32>
    %c0_3 = arith.constant 0 : index
    %c0_4 = arith.constant 0 : index
    %3 = vector.load %arg3[%c0_3, %c0_4] : memref<1x128xf32, #tpu.memory_space<vmem>>, vector<1x128xf32>
    %4 = vector.broadcast %3 : vector<1x128xf32> to vector<16x128xf32>
    %5 = arith.addf %2, %4 : vector<16x128xf32>
    %cst_5 = arith.constant 0.000000e+00 : f32
    %6 = vector.broadcast %cst_5 : f32 to vector<16x128xf32>
    %7 = arith.maximumf %5, %6 : vector<16x128xf32>
    %8 = arith.truncf %7 : vector<16x128xf32> to vector<16x128xbf16>
    %c0_6 = arith.constant 0 : index
    %c0_7 = arith.constant 0 : index
    %9 = vector.load %arg4[%c0_6, %c0_7] : memref<128x128xbf16, #tpu.memory_space<vmem>>, vector<128x128xbf16>
    %cst_8 = arith.constant dense<0.000000e+00> : vector<16x128xf32>
    %10 = tpu.matmul %8, %9, %cst_8 {dimension_numbers = #tpu.dot_dimension_numbers<[1], [0], [0], [1], [0, 0, 1, 1], [], []>} : vector<16x128xbf16>, vector<128x128xbf16>, vector<16x128xf32> -> vector<16x128xf32>
    %c0_9 = arith.constant 0 : index
    %c0_10 = arith.constant 0 : index
    %11 = vector.load %arg5[%c0_9, %c0_10] : memref<1x128xf32, #tpu.memory_space<vmem>>, vector<1x128xf32>
    %12 = vector.broadcast %11 : vector<1x128xf32> to vector<16x128xf32>
    %13 = arith.addf %10, %12 : vector<16x128xf32>
    %c0_11 = arith.constant 0 : index
    %c0_12 = arith.constant 0 : index
    %14 = vector.load %arg6[%c0_11, %c0_12] : memref<16x128xf32, #tpu.memory_space<vmem>>, vector<16x128xf32>
    tpu.vector_store %arg6[%c0_11, %c0_12], %13 {strides = array<i32>} : memref<16x128xf32, #tpu.memory_space<vmem>>, vector<16x128xf32>,
    return
  }
  func.func @transform_0(%arg0: i32) -> (i32, i32) {
    %c0_i32 = arith.constant 0 : i32
    %c0_i32_0 = arith.constant 0 : i32
    return %arg0, %c0_i32 : i32, i32
  }
  func.func @transform_1(%arg0: i32) -> (i32, i32) {
    %c0_i32 = arith.constant 0 : i32
    %c0_i32_0 = arith.constant 0 : i32
    %c0_i32_1 = arith.constant 0 : i32
    return %c0_i32, %c0_i32_0 : i32, i32
  }
  func.func @transform_2(%arg0: i32) -> (i32, i32) {
    %c0_i32 = arith.constant 0 : i32
    %c0_i32_0 = arith.constant 0 : i32
    %c0_i32_1 = arith.constant 0 : i32
    return %c0_i32, %c0_i32_0 : i32, i32
  }
  func.func @transform_3(%arg0: i32) -> (i32, i32) {
    %c0_i32 = arith.constant 0 : i32
    %c0_i32_0 = arith.constant 0 : i32
    %c0_i32_1 = arith.constant 0 : i32
    return %c0_i32, %c0_i32_0 : i32, i32
  }
  func.func @transform_4(%arg0: i32) -> (i32, i32) {
    %c0_i32 = arith.constant 0 : i32
    %c0_i32_0 = arith.constant 0 : i32
    %c0_i32_1 = arith.constant 0 : i32
    return %c0_i32, %c0_i32_0 : i32, i32
  }
  func.func @transform_5(%arg0: i32) -> (i32, i32) {
    %c0_i32 = arith.constant 0 : i32
    %c0_i32_0 = arith.constant 0 : i32
    return %arg0, %c0_i32 : i32, i32
  }
}

</mosaic_0001>

<bundles_post_ra>
// kernel: domain_discriminator.1
= control target key start
LH: loop header
LB: loop body
LE: loop exit
PB: predicated region body
PF: predicated region fallthrough
CT: control target
= control target key end

     0   :  { %10 = vsyncpa [#allocation3], 0  ;;  %s326_s18 = smov [#allocation2]   ;;  %s394_s0 = inlined_call_operand.vmem [shape: bf16[16,32], index: 0, kind: input, shape index: {}]   ;;  %s395_s1 = inlined_call_operand.vmem [shape: bf16[32,128], index: 1, kind: input, shape index: {}]   ;;  %s396_s2 = inlined_call_operand.vmem [shape: f32[1,128], index: 2, kind: input, shape index: {}]   ;;  %s397_s3 = inlined_call_operand.hbm [shape: bf16[128,128], index: 3, kind: input, shape index: {}]   ;;  %s398_s4 = inlined_call_operand.vmem [shape: f32[1,128], index: 4, kind: input, shape index: {}]   ;;  %s399_s5 = inlined_call_operand.vmem [shape: f32[16,128], index: 5, kind: output, shape index: {}]  }
   0x1   :  { %s22_s19 = sshll.u32 %s326_s18, 4  ;;  %s302_s22 = scalar_lea.hbm %s397_s3, 1024  ;;  %s23_s19 = int_to_ptr.vmem [resolvable:$true] %s22_s19 }
   0x2   :  { %p303_p0 = scmp.ne.s32.totalorder %s397_s3, %s302_s22  ;;  %p306_p1 = scmp.lt.u32.totalorder %s302_s22, %s397_s3 }
   0x4   :  { %p308_p2 = pnand %p306_p1, %p303_p0 }
   0x6   :  { %311 = shalt.err (!%p308_p2)
}
   0x7   :  { %s312_s27 = scalar_lea.vmem %s23_s19, 1024  ;;  %p317_p4 = scmp.lt.s32.totalorder %s23_s19, %s23_s19 }
   0x8   :  { %p313_p3 = scmp.ne.s32.totalorder %s23_s19, %s312_s27  ;;  %p318_p5 = scmp.lt.s32.totalorder %s312_s27, %s312_s27 }
   0xa   :  { %p319_p6 = por %p318_p5, %p317_p4 }
   0xc   :  { %p320_p7 = pnand %p319_p6, %p313_p3 }
   0xe   :  { %323 = shalt.err (!%p320_p7)
}
   0xf   :  { %s327_s28 = smov 64   ;;  %s328_s29 = smov 4  }
  0x10   :  { %28 = dma.hbm_to_vmem [thread:$0]  %s397_s3, 1024, %s23_s19, [#allocation3], %s327_s28, %s327_s28, %s328_s29  }
  0x11   :  { %324 = dma.done.wait [#allocation3], 1024  }
  0x12   :  { %325 = vsyncadd [#allocation3], 4294966272  ;;  %v329_v0 = vmov 0.0   ;;  %vm330_vm0 = vmmov 0   ;;  %v291_v1 = vld [vmem:[%s395_s1] sm:$0xff]   ;;  %v292_v2 = vld [vmem:[%s395_s1 + $0x8] sm:$0xff]  }
  0x13   :  { %258 = vmatprep.subr.bf16.mxu0 %v329_v0  ;;  %262 = vmatprep.mubr.msk.bf16.mxu0 %vm330_vm0, %v329_v0  ;;  %v294_v3 = vld [vmem:[#allocation2] sm:$0xff]   ;;  %v293_v4 = vld [vmem:[%s394_s0] sm:$0xff]   ;;  %v295_v5 = vld [vmem:[#allocation2 + $0x8] sm:$0xff]   ;;  %vm65_vm1 = vcmask 261120  }
  0x14   :  { %266 = vmatprep.subr.bf16.mxu1 %v329_v0  ;;  %282 = vmatprep.mubr.msk.bf16.mxu1 %vm330_vm0, %v329_v0  ;;  %v296_v6 = vld [vmem:[#allocation2 + $0x10] sm:$0xff]   ;;  %v297_v7 = vld [vmem:[#allocation2 + $0x18] sm:$0xff]   ;;  %v298_v8 = vld [vmem:[#allocation2 + $0x20] sm:$0xff]  }
  0x15   :  { %259 = vmatpush3.bf16.msra.mxu0 %v291_v1  ;;  %267 = vmatpush3.bf16.msra.mxu1 %v294_v3  ;;  %v299_v9 = vld [vmem:[#allocation2 + $0x28] sm:$0xff]   ;;  %v300_v10 = vld [vmem:[#allocation2 + $0x30] sm:$0xff]   ;;  %v301_v11 = vld [vmem:[#allocation2 + $0x38] sm:$0xff]  }
  0x16   :  { %260 = vmatprep.subr.bf16.mxu0 %v329_v0  ;;  %268 = vmatprep.subr.bf16.mxu1 %v329_v0  ;;  %v232_v12 = vld [vmem:[%s396_s2] ss:$0 sm:$0xff] }
  0x17   :  { %v237_v22 = vld [vmem:[%s398_s4] ss:$0 sm:$0xff] }
  0x19   :  { %261 = vmatpush3.bf16.msra.mxu0 %v292_v2  ;;  %269 = vmatpush3.bf16.msra.mxu1 %v295_v5 }
  0x1a   :  { %270 = vmatprep.subr.bf16.mxu1 %v329_v0 }
  0x1c   :  { %263 = vmatmul.mubr.msk.bf16.vlgmr.msra.gmra.mrb[0].mxu0 %vm65_vm1, %v293_v4 }
  0x1d   :  { %271 = vmatpush3.bf16.msra.mxu1 %v296_v6 }
  0x1e   :  { %272 = vmatprep.subr.bf16.mxu1 %v329_v0 }
  0x21   :  { %273 = vmatpush3.bf16.msra.mxu1 %v297_v7 }
  0x22   :  { %274 = vmatprep.subr.bf16.mxu1 %v329_v0 }
  0x25   :  { %275 = vmatpush3.bf16.msra.mxu1 %v298_v8 }
  0x26   :  { %276 = vmatprep.subr.bf16.mxu1 %v329_v0 }
  0x29   :  { %277 = vmatpush3.bf16.msra.mxu1 %v299_v9 }
  0x2a   :  { %278 = vmatprep.subr.bf16.mxu1 %v329_v0 }
  0x2d   :  { %279 = vmatpush3.bf16.msra.mxu1 %v300_v10 }
  0x2e   :  { %280 = vmatprep.subr.bf16.mxu1 %v329_v0 }
  0x31   :  { %281 = vmatpush3.bf16.msra.mxu1 %v301_v11 }
  0xef   :  { %v103_v13 = vpop.f32.mrb[0].mxu0 }
  0xf0   :  { %v104_v14 = vadd.f32 %v232_v12, %v103_v13  ;;  %v264_v15 = vpop.f32.mrb[1].mxu0 }
  0xf1   :  { %v106_v16 = vpop.f32.mrb[2].mxu0 }
  0xf2   :  { %v107_v17 = vadd.f32 %v232_v12, %v106_v16  ;;  %v265_v18 = vpop.f32.mrb[3].mxu0  ;;  %v110_v19 = vmax.f32 %v104_v14, 0.0 }
  0xf4   :  { %v111_v20 = vmax.f32 %v107_v17, 0.0 }
  0xf6   :  { %v112_v21 = vpack.c.bf16 %v111_v20, %v110_v19 }
  0xf8   :  { %283 = vmatmul.mubr.bf16.vlgmr.msra.gmra.mrb[0].mxu1 %v112_v21 }
 0x1cb   :  { %v218_v23 = vpop.f32.mrb[0].mxu1 }
 0x1cc   :  { %v219_v24 = vadd.f32 %v237_v22, %v218_v23  ;;  %v284_v25 = vpop.f32.mrb[1].mxu1 }
 0x1cd   :  { %v221_v26 = vpop.f32.mrb[2].mxu1 }
 0x1ce   :  { %225 = vst [vmem:[%s399_s5] sm:$0xff] %v219_v24  ;;  %v222_v27 = vadd.f32 %v237_v22, %v221_v26  ;;  %v285_v28 = vpop.f32.mrb[3].mxu1 }
 0x1d0   :  { %226 = vst [vmem:[%s399_s5 + $0x8] sm:$0xff] %v222_v27 }
 0x1d1   :  { %231 = vsyncpa [#allocation3], 1 }

</bundles_post_ra>
